<compile_context>
chip_gen: v5e
topology: v5e:2x2
jax: 0.10.0
libtpu: 0.0.40
codegen_flags: <defaults>
</compile_context>

<pallas_src>
import jax
import jax.numpy as jnp
import numpy as np
from jax.experimental import pallas as pl
from jax.experimental.pallas import tpu as pltpu


def _make_kernel(tc, ae_pad, unroll):
    """Per-chunk kernel: hoisted ento projection + serial in-chunk recurrence."""

    def kernel(ento_ref, v0_ref, wx_ref, wv_ref, out_ref, v_ref):
        # Initialize the carried voltage slab from v0 on the first chunk only.
        @pl.when(pl.program_id(0) == 0)
        def _():
            v_ref[...] = v0_ref[...]

        wx = wx_ref[...]                       # (N, 128)
        wv = wv_ref[...]                       # (128, 128), no +I on diagonal

        b = ento_ref.shape[1]
        n = ento_ref.shape[2]

        # Hoisted ento projection: one (tc*B, N) x (N, 128) matmul per chunk,
        # written lane-dense into the output tile (reused as x_proj storage).
        x = ento_ref[...].reshape(tc * b, n)
        x_proj = jnp.dot(x, wx, preferred_element_type=jnp.float32)
        out_ref[...] = x_proj.reshape(tc, b, ae_pad)

        def step(t, v):                        # v: (B, 128) old-voltage slab
            # Single MXU op per step; residual "+ v" is a VPU add.
            acc = out_ref[t] + jnp.dot(v, wv, preferred_element_type=jnp.float32) + v
            v_new = jnp.clip(acc, -1.0, 1.0)   # == hidden (already in [-1,1])
            out_ref[t] = v_new                 # unmasked 128-lane store
            return v_new

        v_final = jax.lax.fori_loop(0, tc, step, v_ref[...], unroll=unroll)
        v_ref[...] = v_final                   # carry state to next chunk

    return kernel


def _combine_weights(w_ih, w_hh, N, E, ae_pad):
    """Fold per-attribute RNNCell weights into the two fused matmul operands."""
    A = w_ih.shape[0]
    AE = A * E
    # ento -> attribute a occupies output columns a*E:(a+1)*E.
    w_x = jnp.concatenate([w_ih[a, :, :N].T for a in range(A)], axis=1)   # (N, AE)
    # State slab (source attribute p, row block) -> target attribute a (col block).
    rows = []
    for p in range(A):
        cols = []
        for a in range(A):
            if p == a:
                blk = w_hh[a].T                       # residual added in-kernel (VPU)
            else:
                j = [q for q in range(A) if q != a].index(p)
                blk = w_ih[a][:, N + j * E:N + (j + 1) * E].T
            cols.append(blk)
        rows.append(jnp.concatenate(cols, axis=1))
    w_v = jnp.concatenate(rows, axis=0)                                   # (AE, AE)
    # Zero-pad to a lane-dense 128 multiple (padded lanes stay exactly 0).
    w_x = jnp.pad(w_x, ((0, 0), (0, ae_pad - AE)))
    w_v = jnp.pad(w_v, ((0, ae_pad - AE), (0, ae_pad - AE)))
    return w_x, w_v


def episodic_memory_forward(ento_feat, v0, w_ih, w_hh, *, t_chunk=128):
    """ento_feat: (T,B,N) f32; v0: (A,B,E); w_ih: (A,E,IN); w_hh: (A,E,E).
    Returns h trajectory of shape (A, T, B, E)."""
    T, B, N = ento_feat.shape
    A, E, IN = w_ih.shape
    assert IN == N + (A - 1) * E
    AE = A * E
    AE_pad = ((AE + 127) // 128) * 128          # lane-dense output width

    # Time chunking (pad tail with zeros; extra steps are sliced off below).
    tc = min(t_chunk, T)
    n_chunks = -(-T // tc)
    T_pad = n_chunks * tc
    if T_pad != T:
        ento_feat = jnp.pad(ento_feat, ((0, T_pad - T), (0, 0), (0, 0)))

    w_x, w_v = _combine_weights(w_ih, w_hh, N, E, AE_pad)
    v0_slab = jnp.transpose(v0, (1, 0, 2)).reshape(B, AE)
    v0_slab = jnp.pad(v0_slab, ((0, 0), (0, AE_pad - AE)))      # (B, 128)

    out = pl.pallas_call(
        _make_kernel(tc, AE_pad, min(8, tc)),
        out_shape=jax.ShapeDtypeStruct((T_pad, B, AE_pad), jnp.float32),
        grid=(n_chunks,),
        in_specs=[
            pl.BlockSpec((tc, B, N), lambda c: (c, 0, 0)),        # ento chunk
            pl.BlockSpec((B, AE_pad), lambda c: (0, 0)),          # v0 slab
            pl.BlockSpec((N, AE_pad), lambda c: (0, 0)),          # W_x
            pl.BlockSpec((AE_pad, AE_pad), lambda c: (0, 0)),     # W_v
        ],
        out_specs=pl.BlockSpec((tc, B, AE_pad), lambda c: (c, 0, 0)),
        scratch_shapes=[pltpu.VMEM((B, AE_pad), jnp.float32)],    # carried state
        compiler_params=pltpu.CompilerParams(
            dimension_semantics=("arbitrary",),                   # serial recurrence
            vmem_limit_bytes=32 * 1024 * 1024,
        ),
    )(ento_feat, v0_slab, w_x, w_v)

    out = out[:T, :, :AE]                                         # drop T / lane pad
    # (T, B, A*E) -> (A, T, B, E): per-attribute hidden trajectories.
    return jnp.transpose(out.reshape(T, B, A, E), (2, 0, 1, 3))


def reference_forward(ento_feat, v0, w_ih, w_hh):
    """Pure-JAX replica of the PyTorch loop (used only for verification)."""
    T, B, N = ento_feat.shape
    A, E, IN = w_ih.shape
    v = [v0[a] for a in range(A)]
    outs = [[] for _ in range(A)]
    for t in range(T):
        inputs = [
            jnp.concatenate([ento_feat[t]] + [v[p] for p in range(A) if p != a], axis=-1)
            for a in range(A)
        ]
        new_v = []
        for a in range(A):
            vc = jnp.clip(v[a], -1.0, 1.0)
            igates = inputs[a] @ w_ih[a].T
            hgates = vc @ w_hh[a].T
            vn = jnp.clip(igates + hgates + vc, -1.0, 1.0)
            new_v.append(vn)
            outs[a].append(vn)
        v = new_v
    return jnp.stack([jnp.stack(o, 0) for o in outs], 0)


if __name__ == "__main__":
    # Small, forward-implied shapes.
    attribute_list = ["what", "where", "when"]
    A = len(attribute_list)
    ento_size = 16      # N
    em_size = 32        # E (hidden)
    T, B = 8, 8
    IN = ento_size + (A - 1) * em_size

    key = jax.random.PRNGKey(0)
    k_x, k_v, k_ih, k_hh = jax.random.split(key, 4)

    ento_feat = jax.random.normal(k_x, (T, B, ento_size), dtype=jnp.float32)
    # torch.rand(B, hidden) * 2 - 1, done deterministically here:
    v0 = jax.random.uniform(k_v, (A, B, em_size), dtype=jnp.float32) * 2.0 - 1.0

    # nn.RNNCell default init: U(-1/sqrt(hidden), 1/sqrt(hidden))
    bound = 1.0 / np.sqrt(em_size)
    w_ih = jax.random.uniform(k_ih, (A, em_size, IN), dtype=jnp.float32,
                              minval=-bound, maxval=bound)
    w_hh = jax.random.uniform(k_hh, (A, em_size, em_size), dtype=jnp.float32,
                              minval=-bound, maxval=bound)

    # t_chunk=4 -> grid of 2 chunks, exercising the carried-state pipeline.
    out = episodic_memory_forward(ento_feat, v0, w_ih, w_hh, t_chunk=4)
    out = jax.block_until_ready(out)

    ref = reference_forward(ento_feat, v0, w_ih, w_hh)
    np.testing.assert_allclose(np.asarray(out), np.asarray(ref),
                               rtol=1e-4, atol=1e-4)

    # Dict view matching the PyTorch return type {attr: (T, B, em_size)}:
    result = {attr: out[i] for i, attr in enumerate(attribute_list)}
    assert result["what"].shape == (T, B, em_size)

    print("KERNEL_OK")
</pallas_src>

<mosaic_0001>
module attributes {stable_mosaic.version = 11 : i64} {
  func.func @kernel(%arg0: i32, %arg1: memref<4x8x16xf32, #tpu.memory_space<vmem>>, %arg2: memref<8x128xf32, #tpu.memory_space<vmem>>, %arg3: memref<16x128xf32, #tpu.memory_space<vmem>>, %arg4: memref<128x128xf32, #tpu.memory_space<vmem>>, %arg5: memref<4x8x128xf32, #tpu.memory_space<vmem>>, %arg6: memref<8x128xf32, #tpu.memory_space<vmem>>) attributes {dimension_semantics = [#tpu.dimension_semantics<arbitrary>], iteration_bounds = array<i64: 2>, scalar_prefetch = 0 : i64, scratch_operands = 1 : i64, tpu.core_type = #tpu.core_type<tc>, window_params = [{transform_indices = @transform_0, window_bounds = array<i64: 4, 8, 16>}, {pipeline_mode = #tpu.pipeline_mode<synchronous>, transform_indices = @transform_1, window_bounds = array<i64: 8, 128>}, {pipeline_mode = #tpu.pipeline_mode<synchronous>, transform_indices = @transform_2, window_bounds = array<i64: 16, 128>}, {pipeline_mode = #tpu.pipeline_mode<synchronous>, transform_indices = @transform_3, window_bounds = array<i64: 128, 128>}, {transform_indices = @transform_4, window_bounds = array<i64: 4, 8, 128>}]} {
    %c0_i32 = arith.constant 0 : i32
    %0 = arith.cmpi eq, %arg0, %c0_i32 : i32
    %1 = arith.extui %0 : i1 to i32
    %c0_i32_0 = arith.constant 0 : i32
    %2 = arith.cmpi ne, %1, %c0_i32_0 : i32
    scf.if %2 {
      %c0_43 = arith.constant 0 : index
      %c0_44 = arith.constant 0 : index
      %68 = vector.load %arg2[%c0_43, %c0_44] : memref<8x128xf32, #tpu.memory_space<vmem>>, vector<8x128xf32>
      %c0_45 = arith.constant 0 : index
      %c0_46 = arith.constant 0 : index
      %69 = vector.load %arg6[%c0_45, %c0_46] : memref<8x128xf32, #tpu.memory_space<vmem>>, vector<8x128xf32>
      tpu.vector_store %arg6[%c0_45, %c0_46], %68 {strides = array<i32>} : memref<8x128xf32, #tpu.memory_space<vmem>>, vector<8x128xf32>,
    } else {
    }
    %c0 = arith.constant 0 : index
    %c0_1 = arith.constant 0 : index
    %3 = vector.load %arg3[%c0, %c0_1] : memref<16x128xf32, #tpu.memory_space<vmem>>, vector<16x128xf32>
    %c0_2 = arith.constant 0 : index
    %c0_3 = arith.constant 0 : index
    %4 = vector.load %arg4[%c0_2, %c0_3] : memref<128x128xf32, #tpu.memory_space<vmem>>, vector<128x128xf32>
    %c0_4 = arith.constant 0 : index
    %c0_5 = arith.constant 0 : index
    %c0_6 = arith.constant 0 : index
    %5 = vector.load %arg1[%c0_4, %c0_5, %c0_6] : memref<4x8x16xf32, #tpu.memory_space<vmem>>, vector<4x8x16xf32>
    %6 = vector.shape_cast %5 : vector<4x8x16xf32> to vector<32x16xf32>
    %cst = arith.constant dense<0.000000e+00> : vector<32x128xf32>
    %7 = tpu.matmul %6, %3, %cst {dimension_numbers = #tpu.dot_dimension_numbers<[1], [0], [0], [1], [0, 0, 1, 1], [], []>} : vector<32x16xf32>, vector<16x128xf32>, vector<32x128xf32> -> vector<32x128xf32>
    %8 = vector.shape_cast %7 : vector<32x128xf32> to vector<4x8x128xf32>
    %c0_7 = arith.constant 0 : index
    %c0_8 = arith.constant 0 : index
    %c0_9 = arith.constant 0 : index
    %9 = vector.load %arg5[%c0_7, %c0_8, %c0_9] : memref<4x8x128xf32, #tpu.memory_space<vmem>>, vector<4x8x128xf32>
    tpu.vector_store %arg5[%c0_7, %c0_8, %c0_9], %8 {strides = array<i32>} : memref<4x8x128xf32, #tpu.memory_space<vmem>>, vector<4x8x128xf32>,
    %c0_10 = arith.constant 0 : index
    %c0_11 = arith.constant 0 : index
    %10 = vector.load %arg6[%c0_10, %c0_11] : memref<8x128xf32, #tpu.memory_space<vmem>>, vector<8x128xf32>
    %c0_i32_12 = arith.constant 0 : i32
    %11 = arith.index_cast %c0_i32_12 : i32 to index
    %c0_13 = arith.constant 0 : index
    %c0_14 = arith.constant 0 : index
    %12 = vector.load %arg5[%11, %c0_13, %c0_14] : memref<4x8x128xf32, #tpu.memory_space<vmem>>, vector<1x8x128xf32>
    %13 = vector.shape_cast %12 : vector<1x8x128xf32> to vector<8x128xf32>
    %cst_15 = arith.constant dense<0.000000e+00> : vector<8x128xf32>
    %14 = tpu.matmul %10, %4, %cst_15 {dimension_numbers = #tpu.dot_dimension_numbers<[1], [0], [0], [1], [0, 0, 1, 1], [], []>} : vector<8x128xf32>, vector<128x128xf32>, vector<8x128xf32> -> vector<8x128xf32>
    %15 = arith.addf %13, %14 : vector<8x128xf32>
    %16 = arith.addf %15, %10 : vector<8x128xf32>
    %cst_16 = arith.constant -1.000000e+00 : f32
    %cst_17 = arith.constant 1.000000e+00 : f32
    %17 = vector.broadcast %cst_16 : f32 to vector<8x128xf32>
    %18 = arith.maximumf %17, %16 : vector<8x128xf32>
    %19 = vector.broadcast %cst_17 : f32 to vector<8x128xf32>
    %20 = arith.minimumf %19, %18 : vector<8x128xf32>
    %21 = arith.index_cast %c0_i32_12 : i32 to index
    %c0_18 = arith.constant 0 : index
    %c0_19 = arith.constant 0 : index
    %22 = vector.load %arg5[%21, %c0_18, %c0_19] : memref<4x8x128xf32, #tpu.memory_space<vmem>>, vector<1x8x128xf32>
    %23 = vector.shape_cast %22 : vector<1x8x128xf32> to vector<8x128xf32>
    %24 = vector.shape_cast %20 : vector<8x128xf32> to vector<1x8x128xf32>
    tpu.vector_store %arg5[%21, %c0_18, %c0_19], %24 {strides = array<i32>} : memref<4x8x128xf32, #tpu.memory_space<vmem>>, vector<1x8x128xf32>,
    %c1_i32 = arith.constant 1 : i32
    %25 = arith.index_cast %c1_i32 : i32 to index
    %c0_20 = arith.constant 0 : index
    %c0_21 = arith.constant 0 : index
    %26 = vector.load %arg5[%25, %c0_20, %c0_21] : memref<4x8x128xf32, #tpu.memory_space<vmem>>, vector<1x8x128xf32>
    %27 = vector.shape_cast %26 : vector<1x8x128xf32> to vector<8x128xf32>
    %cst_22 = arith.constant dense<0.000000e+00> : vector<8x128xf32>
    %28 = tpu.matmul %20, %4, %cst_22 {dimension_numbers = #tpu.dot_dimension_numbers<[1], [0], [0], [1], [0, 0, 1, 1], [], []>} : vector<8x128xf32>, vector<128x128xf32>, vector<8x128xf32> -> vector<8x128xf32>
    %29 = arith.addf %27, %28 : vector<8x128xf32>
    %30 = arith.addf %29, %20 : vector<8x128xf32>
    %cst_23 = arith.constant -1.000000e+00 : f32
    %cst_24 = arith.constant 1.000000e+00 : f32
    %31 = vector.broadcast %cst_23 : f32 to vector<8x128xf32>
    %32 = arith.maximumf %31, %30 : vector<8x128xf32>
    %33 = vector.broadcast %cst_24 : f32 to vector<8x128xf32>
    %34 = arith.minimumf %33, %32 : vector<8x128xf32>
    %35 = arith.index_cast %c1_i32 : i32 to index
    %c0_25 = arith.constant 0 : index
    %c0_26 = arith.constant 0 : index
    %36 = vector.load %arg5[%35, %c0_25, %c0_26] : memref<4x8x128xf32, #tpu.memory_space<vmem>>, vector<1x8x128xf32>
    %37 = vector.shape_cast %36 : vector<1x8x128xf32> to vector<8x128xf32>
    %38 = vector.shape_cast %34 : vector<8x128xf32> to vector<1x8x128xf32>
    tpu.vector_store %arg5[%35, %c0_25, %c0_26], %38 {strides = array<i32>} : memref<4x8x128xf32, #tpu.memory_space<vmem>>, vector<1x8x128xf32>,
    %c2_i32 = arith.constant 2 : i32
    %39 = arith.index_cast %c2_i32 : i32 to index
    %c0_27 = arith.constant 0 : index
    %c0_28 = arith.constant 0 : index
    %40 = vector.load %arg5[%39, %c0_27, %c0_28] : memref<4x8x128xf32, #tpu.memory_space<vmem>>, vector<1x8x128xf32>
    %41 = vector.shape_cast %40 : vector<1x8x128xf32> to vector<8x128xf32>
    %cst_29 = arith.constant dense<0.000000e+00> : vector<8x128xf32>
    %42 = tpu.matmul %34, %4, %cst_29 {dimension_numbers = #tpu.dot_dimension_numbers<[1], [0], [0], [1], [0, 0, 1, 1], [], []>} : vector<8x128xf32>, vector<128x128xf32>, vector<8x128xf32> -> vector<8x128xf32>
    %43 = arith.addf %41, %42 : vector<8x128xf32>
    %44 = arith.addf %43, %34 : vector<8x128xf32>
    %cst_30 = arith.constant -1.000000e+00 : f32
    %cst_31 = arith.constant 1.000000e+00 : f32
    %45 = vector.broadcast %cst_30 : f32 to vector<8x128xf32>
    %46 = arith.maximumf %45, %44 : vector<8x128xf32>
    %47 = vector.broadcast %cst_31 : f32 to vector<8x128xf32>
    %48 = arith.minimumf %47, %46 : vector<8x128xf32>
    %49 = arith.index_cast %c2_i32 : i32 to index
    %c0_32 = arith.constant 0 : index
    %c0_33 = arith.constant 0 : index
    %50 = vector.load %arg5[%49, %c0_32, %c0_33] : memref<4x8x128xf32, #tpu.memory_space<vmem>>, vector<1x8x128xf32>
    %51 = vector.shape_cast %50 : vector<1x8x128xf32> to vector<8x128xf32>
    %52 = vector.shape_cast %48 : vector<8x128xf32> to vector<1x8x128xf32>
    tpu.vector_store %arg5[%49, %c0_32, %c0_33], %52 {strides = array<i32>} : memref<4x8x128xf32, #tpu.memory_space<vmem>>, vector<1x8x128xf32>,
    %c3_i32 = arith.constant 3 : i32
    %53 = arith.index_cast %c3_i32 : i32 to index
    %c0_34 = arith.constant 0 : index
    %c0_35 = arith.constant 0 : index
    %54 = vector.load %arg5[%53, %c0_34, %c0_35] : memref<4x8x128xf32, #tpu.memory_space<vmem>>, vector<1x8x128xf32>
    %55 = vector.shape_cast %54 : vector<1x8x128xf32> to vector<8x128xf32>
    %cst_36 = arith.constant dense<0.000000e+00> : vector<8x128xf32>
    %56 = tpu.matmul %48, %4, %cst_36 {dimension_numbers = #tpu.dot_dimension_numbers<[1], [0], [0], [1], [0, 0, 1, 1], [], []>} : vector<8x128xf32>, vector<128x128xf32>, vector<8x128xf32> -> vector<8x128xf32>
    %57 = arith.addf %55, %56 : vector<8x128xf32>
    %58 = arith.addf %57, %48 : vector<8x128xf32>
    %cst_37 = arith.constant -1.000000e+00 : f32
    %cst_38 = arith.constant 1.000000e+00 : f32
    %59 = vector.broadcast %cst_37 : f32 to vector<8x128xf32>
    %60 = arith.maximumf %59, %58 : vector<8x128xf32>
    %61 = vector.broadcast %cst_38 : f32 to vector<8x128xf32>
    %62 = arith.minimumf %61, %60 : vector<8x128xf32>
    %63 = arith.index_cast %c3_i32 : i32 to index
    %c0_39 = arith.constant 0 : index
    %c0_40 = arith.constant 0 : index
    %64 = vector.load %arg5[%63, %c0_39, %c0_40] : memref<4x8x128xf32, #tpu.memory_space<vmem>>, vector<1x8x128xf32>
    %65 = vector.shape_cast %64 : vector<1x8x128xf32> to vector<8x128xf32>
    %66 = vector.shape_cast %62 : vector<8x128xf32> to vector<1x8x128xf32>
    tpu.vector_store %arg5[%63, %c0_39, %c0_40], %66 {strides = array<i32>} : memref<4x8x128xf32, #tpu.memory_space<vmem>>, vector<1x8x128xf32>,
    %c4_i32 = arith.constant 4 : i32
    %c0_41 = arith.constant 0 : index
    %c0_42 = arith.constant 0 : index
    %67 = vector.load %arg6[%c0_41, %c0_42] : memref<8x128xf32, #tpu.memory_space<vmem>>, vector<8x128xf32>
    tpu.vector_store %arg6[%c0_41, %c0_42], %62 {strides = array<i32>} : memref<8x128xf32, #tpu.memory_space<vmem>>, vector<8x128xf32>,
    return
  }
  func.func @transform_0(%arg0: i32) -> (i32, i32, i32) {
    %c0_i32 = arith.constant 0 : i32
    %c0_i32_0 = arith.constant 0 : i32
    %c0_i32_1 = arith.constant 0 : i32
    return %arg0, %c0_i32, %c0_i32_0 : i32, i32, i32
  }
  func.func @transform_1(%arg0: i32) -> (i32, i32) {
    %c0_i32 = arith.constant 0 : i32
    %c0_i32_0 = arith.constant 0 : i32
    %c0_i32_1 = arith.constant 0 : i32
    return %c0_i32, %c0_i32_0 : i32, i32
  }
  func.func @transform_2(%arg0: i32) -> (i32, i32) {
    %c0_i32 = arith.constant 0 : i32
    %c0_i32_0 = arith.constant 0 : i32
    %c0_i32_1 = arith.constant 0 : i32
    return %c0_i32, %c0_i32_0 : i32, i32
  }
  func.func @transform_3(%arg0: i32) -> (i32, i32) {
    %c0_i32 = arith.constant 0 : i32
    %c0_i32_0 = arith.constant 0 : i32
    %c0_i32_1 = arith.constant 0 : i32
    return %c0_i32, %c0_i32_0 : i32, i32
  }
  func.func @transform_4(%arg0: i32) -> (i32, i32, i32) {
    %c0_i32 = arith.constant 0 : i32
    %c0_i32_0 = arith.constant 0 : i32
    %c0_i32_1 = arith.constant 0 : i32
    return %arg0, %c0_i32, %c0_i32_0 : i32, i32, i32
  }
}

</mosaic_0001>

<bundles_post_ra>
// kernel: tpu_custom_call.1
= control target key start
LH: loop header
LB: loop body
LE: loop exit
PB: predicated region body
PF: predicated region fallthrough
CT: control target
= control target key end

     0   :  { %9 = vsyncpa [#allocation4], 0  ;;  %s1102_s0 = inlined_call_operand.hbm [shape: f32[8,8,16], index: 0, kind: input, shape index: {}]   ;;  %s1103_s1 = inlined_call_operand.hbm [shape: f32[8,128], index: 1, kind: input, shape index: {}]   ;;  %s1104_s2 = inlined_call_operand.hbm [shape: f32[16,128], index: 2, kind: input, shape index: {}]   ;;  %s1105_s3 = inlined_call_operand.hbm [shape: f32[128,128], index: 3, kind: input, shape index: {}]   ;;  %s1106_s4 = inlined_call_operand.hbm [shape: f32[8,8,128], index: 4, kind: output, shape index: {}]  }
   0x1   :  { %11 = vsyncpa [#allocation4 + $0x1], 0 }
   0x2   :  { %12 = vsyncpa [#allocation7], 0 }
   0x3   :  { %13 = vsyncpa [#allocation10], 0 }
   0x4   :  { %14 = vsyncpa [#allocation5], 0 }
   0x5   :  { %16 = vsyncpa [#allocation5 + $0x1], 0  ;;  %s915_s15 = smov 0   ;;  %s917_s16 = smov 0  }
   0x6   :  { %s919_s17 = smov 0   ;;  %s921_s18 = smov 0  }
   0x7 LB: > { %s936_s19 = sadd.s32 4294967295, %s881_s18   ;;  %s569_s20 = sadd.s32 4294967294, %s881_s18   ;;  %s881_s18 = sphi %s921_s18, %s1118_s18   ;;  %s877_s17 = sphi %s919_s17, %s1117_s17   ;;  %s873_s16 = sphi %s917_s16, %s1116_s16   ;;  %s869_s15 = sphi %s915_s15, %s1115_s15  }
   0x8   : > { %p42_p0 = scmp.ne.s32.totalorder %s873_s16, %s869_s15  ;;  %p43_p1 = scmp.eq.s32.totalorder %s936_s19, 0 }
   0x9   : > { %p129_p2 = scmp.eq.s32.totalorder %s936_s19, 1  ;;  %p135_p3 = scmp.eq.s32.totalorder %s569_s20, 1 }
   0xa   : > { %p945_p4 = por %p43_p1, %p42_p0  ;;  %p570_p5 = scmp.ge.s32.totalorder %s881_s18, 1 }
   0xb   : > { %p950_p6 = por %p135_p3, %p42_p0  ;;  %p142_p7 = scmp.lt.s32.totalorder %s881_s18, 3 }
   0xc   : > { %s154_s25 = sshll.u32 %s1103_s1, 4  ;;  %s883_s27 = smov [#allocation6]   ;;  %s155_s25 = int_to_ptr.hbm [resolvable:$true] %s154_s25 }
   0xd   : > { %p959_p9 = pnand %p570_p5, %p142_p7  ;;  %s156_s28 = sshll.u32 %s883_s27, 4  ;;  %s157_s28 = int_to_ptr.vmem [resolvable:$true] %s156_s28 }
   0xe   : > { %s165_s5 = sshll.u32 %s1104_s2, 4  ;;  %s884_s7 = smov [#allocation8]   ;;  %s166_s5 = int_to_ptr.hbm [resolvable:$true] %s165_s5 }
   0xf   : > { %p622_p11 = pneg %p959_p9  ;;  %s167_s8 = sshll.u32 %s884_s7, 4  ;;  %s168_s8 = int_to_ptr.vmem [resolvable:$true] %s167_s8 }
  0x10   : > { %s885_s9 = smov 128   ;;  %s886_s10 = smov 8  }
  0x11   : > { %p971_p12 = pnand %p622_p11, %p43_p1  ;;  %s179_s13 = sshll.u32 %s1105_s3, 4  ;;  %s180_s13 = int_to_ptr.hbm [resolvable:$true] %s179_s13 }
  0x12   : > { %s887_s14 = smov [#allocation9]   ;;  %s991_s23 = sadd.s32 1, %s881_s18  }
  0x13   : > { %625 = dma.hbm_to_vmem [thread:$0]  (!%p971_p12), %s155_s25, 128, %s157_s28, [#allocation7]  }
  0x14   : > { %628 = dma.hbm_to_vmem [thread:$0]  (!%p971_p12), %s166_s5, 256, %s168_s8, [#allocation7], %s885_s9, %s885_s9, %s886_s10  }
  0x15   : > { %s181_s20 = sshll.u32 %s887_s14, 4  ;;  %s26_s24 = ssub.s32 %s881_s18, %s991_s23  ;;  %s182_s20 = int_to_ptr.vmem [resolvable:$true] %s181_s20 }
  0x16   : > { %631 = dma.hbm_to_vmem [thread:$0]  (!%p971_p12), %s180_s13, 2048, %s182_s20, [#allocation10], %s885_s9, %s885_s9, %s886_s10  }
  0x17   : > { %s29_s25 = sadd.s32 1, %s877_s17  ;;  %p27_p13 = scmp.eq.s32.totalorder %s26_s24, 0 }
  0x18   : > { %p36_p0 = scmp.ne.s32.totalorder %s877_s17, %s873_s16  ;;  %p37_p3 = scmp.eq.s32.totalorder %s881_s18, 0 }
  0x19   : > { %s1000_s27 = scalar_select %p27_p13, %s877_s17, %s29_s25  }
  0x1a   : > { %p1004_p5 = por %p129_p2, %p36_p0  ;;  %p643_p7 = scmp.lt.s32.totalorder %s881_s18, 2 }
  0x1b   : > { %s195_s29 = sand.u32 1, %s877_s17   ;;  %s604_s30 = sshll.u32 %s881_s18, 5 }
  0x1c   : > { %p38_p11 = por %p37_p3, %p36_p0  ;;  %s575_s5 = sshll.u32 %s195_s29, 5 }
  0x1d   : > { %s204_s8 = scalar_lea.hbm %s1102_s0, %s604_s30  ;;  %s199_s12 = scalar_lea.vmem [#allocation3], %s575_s5 }
  0x1e   : > { %s205_s11 = sshll.u32 %s204_s8, 4  ;;  %s207_s13 = sshll.u32 %s199_s12, 4  ;;  %s206_s11 = int_to_ptr.hbm [resolvable:$true] %s205_s11  ;;  %s208_s13 = int_to_ptr.vmem [resolvable:$true] %s207_s13 }
  0x1f   : > { %p1014_p12 = pnand %p643_p7, %p38_p11  ;;  %s196_s20 = scalar_lea.sflag [#allocation4], %s195_s29 }
  0x20   : > { %s777_s24 = sshra.s32 %s206_s11, 4  ;;  %s784_s5 = scalar_lea.hbm %s1102_s0, 64  ;;  %s778_s24 = int_to_ptr.hbm [resolvable:$true] %s777_s24 }
  0x21   : > { %s779_s25 = scalar_lea.hbm %s778_s24, 32  ;;  %p781_p13 = pneg %p1014_p12 }
  0x22   : > { %p780_p2 = scmp.ne.s32.totalorder %s778_s24, %s779_s25  ;;  %p785_p7 = scmp.lt.s32.totalorder %s778_s24, %s1102_s0 }
  0x23   : > { %p786_p11 = scmp.lt.s32.totalorder %s784_s5, %s779_s25 }
  0x24   : > { %p782_p0 = pnand %p781_p13, %p780_p2 }
  0x25   : > { %p787_p10 = por %p786_p11, %p785_p7 }
  0x26   : > { %p783_p3 = pneg %p782_p0 }
  0x28   : > { %p788_p8 = pnand %p787_p10, %p783_p3 }
  0x2a   : > { %791 = shalt.err (!%p788_p8)
}
  0x2b   : > { %635 = dma.hbm_to_vmem [thread:$0]  (!%p1014_p12), %s206_s11, 512, %s208_s13, %s196_s20, %s885_s9, %s885_s9, %s886_s10  }
  0x2c   : > { %219 = sbr.rel (%p959_p9) target bundleno = 640 (0x280), region = 36  ;;  %s1034_s29 = sand.u32 (!%p959_p9), 1, %s873_s16  }
  0x2d   : > { %s579_s12 = sshll.u32 (!%p959_p9), %s1034_s29, 5  ;;  %s222_s24 = scalar_lea.sflag (!%p959_p9), [#allocation4], %s1034_s29 }
  0x2e   : > { %s1038_s25 = scalar_lea.vmem (!%p959_p9), [#allocation3], %s579_s12 }
  0x31   : > { %852 = dma.done.wait (%p945_p4), %s222_s24, 512  }
  0x32   : > { %854 = vsyncadd (%p945_p4), %s222_s24, 4294966784 }
  0x33   : > { %856 = dma.done.wait (%p43_p1), [#allocation7], 384  }
  0x34   : > { %858 = vsyncadd (%p43_p1), [#allocation7], 4294966912 }
  0x35   : > { %860 = dma.done.wait (%p43_p1), [#allocation10], 2048  }
  0x36   : > { %862 = vsyncadd (%p43_p1), [#allocation10], 4294965248  ;;  %s1052_s26 = scalar_lea.vmem [#allocation11], %s579_s12  ;;  %p1113_p8 = scmp.ne.s32.totalorder %s936_s19, 0 }
  0x38   : > { %271 = sbr.rel (%p1113_p8) target bundleno = 63 (0x3f), region = 56 }
  0x3d   : > { %v272_v0 = vld [vmem:[#allocation6] sm:$0xff] }
  0x3e   : > { %273 = vst [vmem:[#allocation2] sm:$0xff] %v272_v0 }
  0x3f PF: > { %v291_v1 = vld [vmem:[#allocation9 + $0x78] sm:$0xff]  ;;  %v290_v2 = vld [vmem:[#allocation9 + $0x70] sm:$0xff]  ;;  %v289_v3 = vld [vmem:[#allocation9 + $0x68] sm:$0xff]  ;;  %vm296_vm0 = vcmask 130048   ;;  %s605_s21 = sshll.u32 %s936_s19, 5  ;;  %s464_s13 = sshll.u32 %s1052_s26, 4  ;;  %s465_s13 = int_to_ptr.vmem [resolvable:$true] %s464_s13 }
  0x40   : > { %344 = vmatpush.msra.mxu1 %v291_v1  ;;  %371 = vmatpush.msra.mxu2 %v291_v1  ;;  %v275_v4 = vld [vmem:[#allocation8 + $0x8] sm:$0xff]  ;;  %v288_v5 = vld [vmem:[#allocation9 + $0x60] sm:$0xff]  ;;  %v274_v6 = vld [vmem:[#allocation8] sm:$0xff]  ;;  %s463_s11 = scalar_lea.hbm %s1106_s4, %s605_s21  ;;  %s452_s20 = scalar_lea.sflag [#allocation5], %s1034_s29 }
  0x41   : > { %398 = vmatpush.msra.mxu3 %v291_v1  ;;  %323 = vmatpush.msra.mxu0 %v275_v4  ;;  %v292_v7 = vld [vmem:[%s1038_s25] sm:$0xff]  ;;  %v287_v8 = vld [vmem:[#allocation9 + $0x58] sm:$0xff]  ;;  %v286_v9 = vld [vmem:[#allocation9 + $0x50] sm:$0xff]  ;;  %s466_s14 = sshll.u32 %s463_s11, 4  ;;  %s827_s7 = scalar_lea.hbm %s1106_s4, 64  ;;  %s467_s14 = int_to_ptr.hbm [resolvable:$true] %s466_s14 }
  0x42   : > { %345 = vmatpush.msra.mxu1 %v290_v2  ;;  %372 = vmatpush.msra.mxu2 %v290_v2  ;;  %v285_v10 = vld [vmem:[#allocation9 + $0x48] sm:$0xff]  ;;  %v284_v11 = vld [vmem:[#allocation9 + $0x40] sm:$0xff]  ;;  %v283_v12 = vld [vmem:[#allocation9 + $0x38] sm:$0xff]  ;;  %s821_s30 = sshra.s32 %s467_s14, 4  ;;  %s822_s30 = int_to_ptr.hbm [resolvable:$true] %s821_s30 }
  0x43   : > { %399 = vmatpush.msra.mxu3 %v290_v2  ;;  %324 = vmatpush.msra.mxu0 %v274_v6  ;;  %v282_v13 = vld [vmem:[#allocation9 + $0x30] sm:$0xff]  ;;  %v281_v14 = vld [vmem:[#allocation9 + $0x28] sm:$0xff]  ;;  %v280_v15 = vld [vmem:[#allocation9 + $0x20] sm:$0xff]  ;;  %s823_s6 = scalar_lea.hbm %s822_s30, 32  ;;  %p828_p10 = scmp.lt.s32.totalorder %s822_s30, %s1106_s4 }
  0x44   : > { %346 = vmatpush.msra.mxu1 %v289_v3  ;;  %373 = vmatpush.msra.mxu2 %v289_v3  ;;  %v279_v16 = vld [vmem:[#allocation9 + $0x18] sm:$0xff]  ;;  %v278_v17 = vld [vmem:[#allocation9 + $0x10] sm:$0xff]  ;;  %v277_v18 = vld [vmem:[#allocation9 + $0x8] sm:$0xff]  ;;  %p824_p1 = scmp.ne.s32.totalorder %s822_s30, %s823_s6  ;;  %p829_p12 = scmp.lt.s32.totalorder %s827_s7, %s823_s6 }
  0x45   : > { %400 = vmatpush.msra.mxu3 %v289_v3  ;;  %585 = vmatmul.msk.f32.vlgmr.msra.gmra.mxu0 %vm296_vm0, %v292_v7  ;;  %v276_v19 = vld [vmem:[#allocation9] sm:$0xff]  ;;  %v293_v21 = vld [vmem:[%s1038_s25 + $0x8] sm:$0xff]  ;;  %v294_v27 = vld [vmem:[%s1038_s25 + $0x10] sm:$0xff] }
  0x46   : > { %347 = vmatpush.msra.mxu1 %v288_v5  ;;  %374 = vmatpush.msra.mxu2 %v288_v5  ;;  %v342_v20 = vld [vmem:[#allocation2] sm:$0xff]  ;;  %p825_p4 = pnand %p824_p1, %p1004_p5  ;;  %p830_p2 = por %p829_p12, %p828_p10 }
  0x47   : > { %401 = vmatpush.msra.mxu3 %v288_v5  ;;  %425 = vmatpush.msrb.mxu0 %v291_v1  ;;  %v295_v33 = vld [vmem:[%s1038_s25 + $0x18] sm:$0xff] }
  0x48   : > { %348 = vmatpush.msra.mxu1 %v287_v8  ;;  %375 = vmatpush.msra.mxu2 %v287_v8  ;;  %p826_p9 = pneg %p825_p4 }
  0x49   : > { %402 = vmatpush.msra.mxu3 %v287_v8  ;;  %426 = vmatpush.msrb.mxu0 %v290_v2 }
  0x4a   : > { %349 = vmatpush.msra.mxu1 %v286_v9  ;;  %376 = vmatpush.msra.mxu2 %v286_v9  ;;  %p831_p13 = pnand %p830_p2, %p826_p9 }
  0x4b   : > { %403 = vmatpush.msra.mxu3 %v286_v9  ;;  %427 = vmatpush.msrb.mxu0 %v289_v3 }
  0x4c   : > { %350 = vmatpush.msra.mxu1 %v285_v10  ;;  %377 = vmatpush.msra.mxu2 %v285_v10 }
  0x4d   : > { %404 = vmatpush.msra.mxu3 %v285_v10  ;;  %428 = vmatpush.msrb.mxu0 %v288_v5 }
  0x4e   : > { %351 = vmatpush.msra.mxu1 %v284_v11  ;;  %378 = vmatpush.msra.mxu2 %v284_v11 }
  0x4f   : > { %405 = vmatpush.msra.mxu3 %v284_v11  ;;  %429 = vmatpush.msrb.mxu0 %v287_v8 }
  0x50   : > { %352 = vmatpush.msra.mxu1 %v283_v12  ;;  %379 = vmatpush.msra.mxu2 %v283_v12 }
  0x51   : > { %406 = vmatpush.msra.mxu3 %v283_v12  ;;  %430 = vmatpush.msrb.mxu0 %v286_v9 }
  0x52   : > { %353 = vmatpush.msra.mxu1 %v282_v13  ;;  %380 = vmatpush.msra.mxu2 %v282_v13 }
  0x53   : > { %407 = vmatpush.msra.mxu3 %v282_v13  ;;  %431 = vmatpush.msrb.mxu0 %v285_v10 }
  0x54   : > { %354 = vmatpush.msra.mxu1 %v281_v14  ;;  %381 = vmatpush.msra.mxu2 %v281_v14 }
  0x55   : > { %408 = vmatpush.msra.mxu3 %v281_v14  ;;  %432 = vmatpush.msrb.mxu0 %v284_v11 }
  0x56   : > { %355 = vmatpush.msra.mxu1 %v280_v15  ;;  %382 = vmatpush.msra.mxu2 %v280_v15 }
  0x57   : > { %409 = vmatpush.msra.mxu3 %v280_v15  ;;  %433 = vmatpush.msrb.mxu0 %v283_v12 }
  0x58   : > { %356 = vmatpush.msra.mxu1 %v279_v16  ;;  %383 = vmatpush.msra.mxu2 %v279_v16 }
  0x59   : > { %410 = vmatpush.msra.mxu3 %v279_v16  ;;  %434 = vmatpush.msrb.mxu0 %v282_v13 }
  0x5a   : > { %357 = vmatpush.msra.mxu1 %v278_v17  ;;  %384 = vmatpush.msra.mxu2 %v278_v17 }
  0x5b   : > { %411 = vmatpush.msra.mxu3 %v278_v17  ;;  %435 = vmatpush.msrb.mxu0 %v281_v14 }
  0x5c   : > { %358 = vmatpush.msra.mxu1 %v277_v18  ;;  %385 = vmatpush.msra.mxu2 %v277_v18 }
  0x5d   : > { %412 = vmatpush.msra.mxu3 %v277_v18  ;;  %436 = vmatpush.msrb.mxu0 %v280_v15 }
  0x5e   : > { %359 = vmatpush.msra.mxu1 %v276_v19  ;;  %386 = vmatpush.msra.mxu2 %v276_v19 }
  0x5f   : > { %360 = vmatmul.f32.vlgmr.msra.gmra.mxu1 %v342_v20  ;;  %413 = vmatpush.msra.mxu3 %v276_v19 }
  0x60   : > { %437 = vmatpush.msrb.mxu0 %v279_v16 }
  0x61   : > { %586 = vmatmul.msk.f32.gmra.mxu0 %vm296_vm0, %v293_v21 }
  0x62   : > { %438 = vmatpush.msrb.mxu0 %v278_v17 }
  0x64   : > { %439 = vmatpush.msrb.mxu0 %v277_v18 }
  0x66   : > { %440 = vmatpush.msrb.mxu0 %v276_v19 }
  0x69   : > { %587 = vmatmul.msk.f32.gmra.mxu0 %vm296_vm0, %v294_v27 }
  0x71   : > { %588 = vmatmul.msk.f32.gmra.mxu0 %vm296_vm0, %v295_v33 }
  0xc2   : > { %v326_v22 = vpop.f32.mrf.mxu0 }
  0xdc   : > { %v361_v23 = vpop.f32.mrf.mxu1 }
  0xdd   : > { %v364_v24 = vadd.f32 %v361_v23, %v326_v22 }
  0xde   : > { %v329_v28 = vpop.f32.mrf.mxu0 }
  0xdf   : > { %v365_v25 = vadd.f32 %v364_v24, %v342_v20 }
  0xe1   : > { %v589_v26 = vclamps-f32 %v365_v25, 1.0 }
  0xe3   : > { %368 = vst [vmem:[%s1052_s26] sm:$0xff] %v589_v26  ;;  %387 = vmatmul.f32.vlgmr.msra.gmra.mxu2 %v589_v26 }
  0xe6   : > { %v332_v34 = vpop.f32.mrf.mxu0 }
  0xee   : > { %v335_v39 = vpop.f32.mrf.mxu0 }
 0x166   : > { %v388_v29 = vpop.f32.mrf.mxu2 }
 0x167   : > { %v391_v30 = vadd.f32 %v388_v29, %v329_v28 }
 0x169   : > { %v392_v31 = vadd.f32 %v589_v26, %v391_v30 }
 0x16b   : > { %v591_v32 = vclamps-f32 %v392_v31, 1.0 }
 0x16d   : > { %592 = vst [vmem:[%s1052_s26 + $0x8] sm:$0xff] %v591_v32  ;;  %414 = vmatmul.f32.vlgmr.msra.gmra.mxu3 %v591_v32 }
 0x1f0   : > { %v415_v35 = vpop.f32.mrf.mxu3 }
 0x1f1   : > { %v418_v36 = vadd.f32 %v415_v35, %v332_v34 }
 0x1f3   : > { %v419_v37 = vadd.f32 %v591_v32, %v418_v36 }
 0x1f5   : > { %v594_v38 = vclamps-f32 %v419_v37, 1.0 }
 0x1f7   : > { %595 = vst [vmem:[%s1052_s26 + $0x10] sm:$0xff] %v594_v38  ;;  %441 = vmatmul.f32.vlgmr.msrb.gmra.mxu0 %v594_v38 }
 0x274   : > { %v442_v40 = vpop.f32.mrf.mxu0 }
 0x275   : > { %v445_v41 = vadd.f32 %v442_v40, %v335_v39 }
 0x277   : > { %v446_v42 = vadd.f32 %v594_v38, %v445_v41 }
 0x279   : > { %v597_v43 = vclamps-f32 %v446_v42, 1.0 }
 0x27b   : > { %598 = vst [vmem:[%s1052_s26 + $0x18] sm:$0xff] %v597_v43 }
 0x27c   : > { %450 = vst [vmem:[#allocation2] sm:$0xff] %v597_v43 }
 0x27d   : > { %834 = shalt.err (!%p831_p13)
}
 0x27e   : > { %s888_s29 = smov 128   ;;  %s889_s24 = smov 8  }
 0x27f   : > { %620 = dma.vmem_to_hbm [thread:$0]  (%p1004_p5), %s465_s13, 512, %s467_s14, %s452_s20, %s888_s29, %s888_s29, %s889_s24  }
 0x280 PF: > { %s481_s25 = sand.u32 1, %s869_s15   ;;  %p1114_p0 = scmp.ge.s32.totalorder %s881_s18, 2 }
 0x281   : > { %s482_s26 = scalar_lea.sflag [#allocation5], %s481_s25 }
 0x282   : > { %p637_p3 = pnand %p1114_p0, %p950_p6 }
 0x284   : > { %p638_p7 = pneg %p637_p3 }
 0x286   : > { %864 = dma.done.wait (%p638_p7), %s482_s26, 512  }
 0x287   : > { %866 = vsyncadd (%p638_p7), %s482_s26, 4294966784  ;;  %p19_p11 = scmp.ge.s32.totalorder %s991_s23, 4   ;;  %s1115_s15 = smov %s873_s16 }
 0x288   : > { %s1116_s16 = smov %s877_s17  ;;  %s1117_s17 = smov %s1000_s27 }
 0x289   : > { %s1118_s18 = smov %s991_s23  ;;  %21 = sbr.rel (!%p19_p11) target bundleno = 7 (0x7), region = 100 }
 0x28e   :  { %488 = vsyncpa [#allocation4], 1 }
 0x28f   :  { %490 = vsyncpa [#allocation4 + $0x1], 1 }
 0x290   :  { %491 = vsyncpa [#allocation7], 1 }
 0x291   :  { %492 = vsyncpa [#allocation10], 1 }
 0x292   :  { %493 = vsyncpa [#allocation5], 1 }
 0x293   :  { %495 = vsyncpa [#allocation5 + $0x1], 1 }

</bundles_post_ra>
